<compile_context>
chip_gen: v5e
topology: v5e:2x2
jax: 0.10.0
libtpu: 0.0.40
codegen_flags: <defaults>
</compile_context>

<pallas_src>
import jax
import jax.numpy as jnp
from jax import lax
from jax.experimental import pallas as pl
from jax.experimental.pallas import tpu as pltpu

LANES = 128
SUBLANES = 8
_MAX_CHUNK_ROWS = 512          # rows per in-kernel chunk (256 KiB f32 temps)


def _round_up(a, b):
    return ((a + b - 1) // b) * b


def _make_bce_partial_kernel(total_rows, tile_rows, chunk_rows, need_mask):
    """Kernel: reduce one (tile_rows, 128) tile of x,t to an (8,128) f32 partial
    of sum( t*clamp(log x, -100) + (1-t)*clamp(log(1-x), -100) )  (== -loss)."""
    nchunks = tile_rows // chunk_rows

    def kernel(x_ref, t_ref, out_ref):
        base_row = pl.program_id(0) * tile_rows
        if need_mask:
            # Hoisted out of the chunk loop (JAX does not CSE broadcasts).
            row_iota = lax.broadcasted_iota(jnp.int32, (chunk_rows, LANES), 0)

        def chunk_partial(r0):
            x = x_ref[pl.ds(r0, chunk_rows), :].astype(jnp.float32)
            t = t_ref[pl.ds(r0, chunk_rows), :].astype(jnp.float32)
            log_x = jnp.maximum(jnp.log(x), -100.0)
            log_1mx = jnp.maximum(jnp.log1p(-x), -100.0)
            # t*log_x + (1-t)*log_1mx, one mul saved; negation deferred to wrapper.
            val = log_1mx + t * (log_x - log_1mx)
            if need_mask:
                # Zero out the Pallas edge-block garbage rows (select kills any NaN).
                row = row_iota + (base_row + r0)
                val = jnp.where(row < total_rows, val, 0.0)
            # Pure VPU row-axis reduce, lane layout kept: (chunk,128) -> (8,128).
            return val.reshape(chunk_rows // SUBLANES, SUBLANES, LANES).sum(axis=0)

        if nchunks == 1:
            out_ref[...] = chunk_partial(0)
        else:
            def body(c, acc):
                r0 = pl.multiple_of(c * chunk_rows, chunk_rows)
                return acc + chunk_partial(r0)
            out_ref[...] = lax.fori_loop(
                0, nchunks, body,
                jnp.zeros((SUBLANES, LANES), jnp.float32),
                unroll=(nchunks <= 8))

    return kernel


def bce_loss_sum(inp, target, *, tile_rows=4096):
    """Equivalent of BCELoss()(input, target): sum over all elements.

    Callers may pass bf16 inputs directly — the f32 upcast happens in-kernel,
    so bf16 ships half the HBM bytes (the kernel is HBM-bound on v5e/v6e).
    """
    target = jnp.reshape(target, inp.shape)          # target.view(input.shape)
    x = jnp.ravel(inp)                               # free (bitcast) reshape
    t = jnp.ravel(target)
    n = x.shape[0]
    if n == 0:
        return jnp.float32(0.0)

    # Lane-dense presentation.  Only when n is not a multiple of 128 do we pad
    # (by < 128 elements) with x = t = 1.0, which contributes exactly zero loss
    # under the pre-multiply clamp.  The common multiple-of-128 case is
    # zero-copy: the ragged *block* tail is masked in-kernel instead of padded.
    rem = n % LANES
    if rem:
        # TODO(synk): sub-128-ragged inputs still cost one XLA pad copy per
        # stream; avoiding it entirely would need manual 1-D DMA + VMEM relayout.
        pad = LANES - rem
        x = jnp.pad(x, (0, pad), constant_values=1.0)
        t = jnp.pad(t, (0, pad), constant_values=1.0)
    rows = x.shape[0] // LANES
    x2 = x.reshape(rows, LANES)
    t2 = t.reshape(rows, LANES)

    # --- Tile-size selection -------------------------------------------------
    itemsize = min(x2.dtype.itemsize, t2.dtype.itemsize)
    align = max(SUBLANES, 32 // max(1, itemsize))    # 8 f32 / 16 bf16 / 32 int8
    rows_al = _round_up(rows, align)
    tr = min(_round_up(int(tile_rows), align), rows_al)
    # v7x megacore: keep >= 2 grid steps on the "parallel" axis whenever there
    # is enough work to split across the two TensorCores.
    if pl.cdiv(rows, tr) < 2 and rows_al >= 2 * align:
        tr = _round_up(pl.cdiv(rows_al, 2), align)
    # In-kernel chunking keeps f32 temporaries small (no (tr,128) f32 buffers).
    if tr >= _MAX_CHUNK_ROWS:
        chunk = _MAX_CHUNK_ROWS
        tr = (tr // chunk) * chunk
    else:
        chunk = tr
    num_blocks = pl.cdiv(rows, tr)
    need_mask = (rows % tr) != 0        # last (edge) block carries garbage rows

    kernel = _make_bce_partial_kernel(rows, tr, chunk, need_mask)

    # VMEM budget: 2 streams x 2 pipeline buffers x one (tr,128) block, plus the
    # small per-chunk f32 temporaries, plus headroom.
    in_bytes = 2 * tr * LANES * (x2.dtype.itemsize + t2.dtype.itemsize)
    vmem_limit = int(in_bytes + 8 * chunk * LANES * 4 + (4 << 20))
    vmem_limit = min(max(vmem_limit, 16 << 20), 64 << 20)

    partials = pl.pallas_call(
        kernel,
        out_shape=jax.ShapeDtypeStruct((num_blocks * SUBLANES, LANES), jnp.float32),
        grid_spec=pltpu.PrefetchScalarGridSpec(
            num_scalar_prefetch=0,
            grid=(num_blocks,),
            in_specs=[
                pl.BlockSpec((tr, LANES), lambda i: (i, 0)),
                pl.BlockSpec((tr, LANES), lambda i: (i, 0)),
            ],
            out_specs=pl.BlockSpec((SUBLANES, LANES), lambda i: (i, 0)),
        ),
        compiler_params=pltpu.CompilerParams(
            dimension_semantics=("parallel",),
            vmem_limit_bytes=vmem_limit,
        ),
    )(x2, t2)

    # Kernel accumulated t*log(x) + (1-t)*log(1-x) (<= 0); negate once here.
    return -jnp.sum(partials)


def _reference(inp, target):
    t = target.reshape(inp.shape).astype(jnp.float32)
    x = inp.astype(jnp.float32)
    return jnp.sum(
        -(t * jnp.maximum(jnp.log(x), -100.0)
          + (1.0 - t) * jnp.maximum(jnp.log1p(-x), -100.0))
    )


if __name__ == "__main__":
    key = jax.random.PRNGKey(0)
    k1, k2, k3, k4, k5, k6 = jax.random.split(key, 6)

    f = jax.jit(bce_loss_sum)

    # Case 1: NCHW image-VAE shape, element count a multiple of 128
    # (zero-copy path, 2 parallel grid blocks, no in-kernel mask).
    B, C, H, W = 2, 4, 16, 16
    inp = jax.nn.sigmoid(jax.random.normal(k1, (B, C, H, W), jnp.float32))
    target = jax.random.uniform(k2, (B * C * H * W,), jnp.float32)
    loss = f(inp, target)
    jax.block_until_ready(loss)
    ref = _reference(inp, target)
    assert jnp.allclose(loss, ref, rtol=1e-4, atol=1e-3), (loss, ref)

    # Case 2: ragged n % 128 != 0 -> tiny zero-loss pad + in-kernel edge mask.
    inp2 = jax.nn.sigmoid(jax.random.normal(k3, (2, 3, 7, 5), jnp.float32))
    target2 = jax.random.uniform(k4, (2 * 3 * 7 * 5,), jnp.float32)
    loss2 = f(inp2, target2)
    jax.block_until_ready(loss2)
    ref2 = _reference(inp2, target2)
    assert jnp.allclose(loss2, ref2, rtol=1e-4, atol=1e-3), (loss2, ref2)

    # Case 3: bf16 inputs (in-kernel f32 upcast), 2 blocks, masked edge block.
    inp3 = jax.nn.sigmoid(jax.random.normal(k5, (4, 1, 28, 28), jnp.bfloat16))
    target3 = jax.random.uniform(k6, (4 * 1 * 28 * 28,), jnp.bfloat16)
    loss3 = f(inp3, target3)
    jax.block_until_ready(loss3)
    ref3 = _reference(inp3, target3)
    assert jnp.allclose(loss3, ref3, rtol=1e-4, atol=1e-3), (loss3, ref3)

    print("KERNEL_OK")
</pallas_src>

<mosaic_0001>
module attributes {stable_mosaic.version = 11 : i64} {
  func.func @kernel(%arg0: i32, %arg1: memref<8x128xf32, #tpu.memory_space<vmem>>, %arg2: memref<8x128xf32, #tpu.memory_space<vmem>>, %arg3: memref<8x128xf32, #tpu.memory_space<vmem>>) attributes {dimension_semantics = [#tpu.dimension_semantics<parallel>], iteration_bounds = array<i64: 2>, scalar_prefetch = 0 : i64, scratch_operands = 0 : i64, tpu.core_type = #tpu.core_type<tc>, window_params = [{transform_indices = @transform_0, window_bounds = array<i64: 8, 128>}, {transform_indices = @transform_1, window_bounds = array<i64: 8, 128>}, {transform_indices = @transform_2, window_bounds = array<i64: 8, 128>}]} {
    %c0 = arith.constant 0 : index
    %c0_0 = arith.constant 0 : index
    %0 = vector.load %arg1[%c0, %c0_0] : memref<8x128xf32, #tpu.memory_space<vmem>>, vector<8x128xf32>
    %c0_1 = arith.constant 0 : index
    %c0_2 = arith.constant 0 : index
    %1 = vector.load %arg2[%c0_1, %c0_2] : memref<8x128xf32, #tpu.memory_space<vmem>>, vector<8x128xf32>
    %2 = math.log %0 : vector<8x128xf32>
    %cst = arith.constant -1.000000e+02 : f32
    %3 = vector.broadcast %cst : f32 to vector<8x128xf32>
    %4 = arith.maximumf %2, %3 : vector<8x128xf32>
    %cst_3 = arith.constant 0.000000e+00 : f32
    %5 = vector.broadcast %cst_3 : f32 to vector<8x128xf32>
    %6 = arith.subf %5, %0 : vector<8x128xf32>
    %7 = math.log1p %6 : vector<8x128xf32>
    %cst_4 = arith.constant -1.000000e+02 : f32
    %8 = vector.broadcast %cst_4 : f32 to vector<8x128xf32>
    %9 = arith.maximumf %7, %8 : vector<8x128xf32>
    %10 = arith.subf %4, %9 : vector<8x128xf32>
    %11 = arith.mulf %1, %10 : vector<8x128xf32>
    %12 = arith.addf %9, %11 : vector<8x128xf32>
    %13 = vector.shape_cast %12 : vector<8x128xf32> to vector<1x8x128xf32>
    %cst_5 = arith.constant dense<0.000000e+00> : vector<8x128xf32>
    %14 = vector.multi_reduction <add>, %13, %cst_5 [0] : vector<1x8x128xf32> to vector<8x128xf32>
    %c0_6 = arith.constant 0 : index
    %c0_7 = arith.constant 0 : index
    %15 = vector.load %arg3[%c0_6, %c0_7] : memref<8x128xf32, #tpu.memory_space<vmem>>, vector<8x128xf32>
    tpu.vector_store %arg3[%c0_6, %c0_7], %14 {strides = array<i32>} : memref<8x128xf32, #tpu.memory_space<vmem>>, vector<8x128xf32>,
    return
  }
  func.func @transform_0(%arg0: i32) -> (i32, i32) {
    %c0_i32 = arith.constant 0 : i32
    %c0_i32_0 = arith.constant 0 : i32
    return %arg0, %c0_i32 : i32, i32
  }
  func.func @transform_1(%arg0: i32) -> (i32, i32) {
    %c0_i32 = arith.constant 0 : i32
    %c0_i32_0 = arith.constant 0 : i32
    return %arg0, %c0_i32 : i32, i32
  }
  func.func @transform_2(%arg0: i32) -> (i32, i32) {
    %c0_i32 = arith.constant 0 : i32
    %c0_i32_0 = arith.constant 0 : i32
    return %arg0, %c0_i32 : i32, i32
  }
}

</mosaic_0001>

<bundles_post_ra>
// kernel: bce_loss_sum.1
= control target key start
LH: loop header
LB: loop body
LE: loop exit
PB: predicated region body
PF: predicated region fallthrough
CT: control target
= control target key end

     0   :  { %s287_s9 = smov 0   ;;  %s307_s0 = inlined_call_operand.vmem [shape: f32[16,128], index: 0, kind: input, shape index: {}]   ;;  %s308_s1 = inlined_call_operand.vmem [shape: f32[16,128], index: 1, kind: input, shape index: {}]   ;;  %s309_s2 = inlined_call_operand.vmem [shape: f32[16,128], index: 2, kind: output, shape index: {}]  }
   0x1 LB: > { %s242_s10 = sadd.s32 4294967295, %s270_s9   ;;  %p246_p0 = scmp.ge.s32.totalorder %s270_s9, 1  ;;  %s270_s9 = sphi %s287_s9, %s12_s9  }
   0x2   : > { %p120_p1 = scmp.lt.s32.totalorder %s270_s9, 3 }
   0x4   : > { %p121_p2 = pnand %p246_p0, %p120_p1 }
   0x5   : > { %p144_p3 = scmp.lt.s32.totalorder (!%p121_p2), %s242_s10, 1 }
   0x6   : > { %124 = sbr.rel (%p121_p2) target bundleno = 38 (0x26), region = 28 }
   0xb   : > { %s311_s10 = smov (!%p144_p3, %s242_s10), 1 }
   0xc   : > { %s247_s11 = sshll.u32 %s311_s10, 3 }
   0xd   : > { %s147_s14 = scalar_lea.vmem %s307_s0, %s247_s11  ;;  %s151_s17 = scalar_lea.vmem %s308_s1, %s247_s11 }
   0xe   : > { %v156_v0 = vld [vmem:[%s147_s14] sm:$0xff]  ;;  %s155_s20 = scalar_lea.vmem %s309_s2, %s247_s11 }
   0xf   : > { %260 = vlog2.f32 %v156_v0  ;;  %v161_v1 = vsub.f32 0.0, %v156_v0  ;;  %v157_v14 = vld [vmem:[%s151_s17] sm:$0xff] }
  0x11   : > { %v162_v2 = vadd.f32 1.0, %v161_v1  ;;  %v165_v3 = vmul.f32 -0.5, %v161_v1  ;;  %v168_v6 = vand.u32 2147483647, %v161_v1 }
  0x13   : > { %262 = vlog2.f32 %v162_v2  ;;  %v166_v4 = vadd.f32 1.0, %v165_v3  ;;  %vm169_vm0 = vcmp.lt.f32.partialorder %v168_v6, 0.0004427343 }
  0x15   : > { %v261_v5 = vpop.eup %260  ;;  %v167_v8 = vmul.f32 %v166_v4, %v161_v1 }
  0x16   : > { %v159_v7 = vmul.f32 0.6931472, %v261_v5 }
  0x18   : > { %v160_v11 = vmax.f32 %v159_v7, -100.0 }
  0x19   : > { %v263_v9 = vpop.eup %262 }
  0x1a   : > { %v164_v10 = vmul.f32 0.6931472, %v263_v9 }
  0x1c   : > { %v170_v12 = vsel %vm169_vm0, %v167_v8, %v164_v10 }
  0x1d   : > { %v171_v13 = vmax.f32 %v170_v12, -100.0 }
  0x1f   : > { %v172_v15 = vsub.f32 %v160_v11, %v171_v13 }
  0x21   : > { %v173_v16 = vmul.f32 %v172_v15, %v157_v14 }
  0x23   : > { %v174_v17 = vadd.f32 %v173_v16, %v171_v13 }
  0x25   : > { %176 = vst [vmem:[%s155_s20] sm:$0xff] %v174_v17 }
  0x26 PF: > { %s12_s9 = sadd.s32 1, %s270_s9  }
  0x27   : > { %p9_p4 = scmp.ge.s32.totalorder %s12_s9, 4  }
  0x29   :  { %11 = sbr.rel (!%p9_p4) target bundleno = 1 (0x1), region = 61 }

</bundles_post_ra>
